<compile_context>
chip_gen: v6e
topology: v6e:2x2x1
jax: 0.10.0
libtpu: 0.0.40
codegen_flags: <defaults>
</compile_context>

<pallas_src>
import jax
import jax.numpy as jnp
from jax.experimental import pallas as pl
from jax.experimental.pallas import tpu as pltpu

_LANE = 128
_MIB = 1024 * 1024


def _relu_kernel(x_ref, o_ref):
    # Elementwise hot path: one lane-dense tile per grid step, pure VPU vmax.
    o_ref[...] = jnp.maximum(x_ref[...], jnp.zeros((), dtype=o_ref.dtype))


def _chip_config():
    """Return (target_block_bytes, vmem_limit_bytes_or_None, min_grid_steps)."""
    kind = ""
    try:
        kind = jax.devices()[0].device_kind.lower()
    except Exception:  # pragma: no cover - conservative fallback
        pass
    if "v7" in kind:
        # 8 MiB block -> 32 MiB for double-buffered in+out; allow it explicitly.
        return 8 * _MIB, 40 * _MIB, 4
    if "v6" in kind:
        # 4 MiB block -> 16 MiB, under the 32 MiB default scoped limit.
        return 4 * _MIB, None, 2
    if "v5" in kind:
        # 2 MiB block -> 8 MiB, under the 16 MiB default scoped limit.
        return 2 * _MIB, None, 2
    return 2 * _MIB, None, 2


def _choose_aligned_cols(n):
    """Largest 'nice' lane-dense width that divides n exactly, else None."""
    for c in (8192, 4096, 2048, 1024, 512, 256, 128):
        if n % c == 0:
            return c
    return None


def _relu_2d(x2d):
    """Run the Pallas ReLU kernel on a 2-D view (no padding, no extra copies)."""
    rows, cols = x2d.shape
    itemsize = jnp.dtype(x2d.dtype).itemsize
    sublane = max(8, 32 // itemsize)  # f32: 8, bf16: 16, int8/fp8: 32
    target_bytes, vmem_limit, min_steps = _chip_config()

    # Column blocking: keep the full last dim (legal at any width) unless a
    # single row alone exceeds the per-block budget, in which case tile it
    # with a 128-multiple block (Pallas masks the partial tail block).
    if cols * itemsize > target_bytes and cols > _LANE:
        block_cols = max(_LANE,
                         (target_bytes // (sublane * itemsize)) // _LANE * _LANE)
        block_cols = min(block_cols, (cols // _LANE) * _LANE)
    else:
        block_cols = cols

    # Row blocking: ~target_bytes per block, dtype-aware sublane multiple.
    block_rows = max(sublane, target_bytes // (block_cols * itemsize))
    block_rows = (block_rows // sublane) * sublane

    # Keep >= min_steps grid steps when the tensor spans multiple blocks so
    # v7x's two TensorCores both get work (no effect on v5e/v6e: 1 TC).
    if rows > block_rows and block_cols == cols:
        cap = max(sublane, (pl.cdiv(rows, min_steps) // sublane) * sublane)
        block_rows = min(block_rows, cap)

    if rows <= block_rows:
        block_rows = rows  # full-extent block dim: always legal

    grid = (pl.cdiv(rows, block_rows), pl.cdiv(cols, block_cols))

    n = rows * cols
    cost = pl.CostEstimate(flops=n, transcendentals=0,
                           bytes_accessed=2 * n * itemsize)

    return pl.pallas_call(
        _relu_kernel,
        out_shape=jax.ShapeDtypeStruct((rows, cols), x2d.dtype),
        grid_spec=pltpu.PrefetchScalarGridSpec(
            num_scalar_prefetch=0,
            grid=grid,
            in_specs=[pl.BlockSpec((block_rows, block_cols), lambda i, j: (i, j))],
            out_specs=pl.BlockSpec((block_rows, block_cols), lambda i, j: (i, j)),
        ),
        compiler_params=pltpu.CompilerParams(
            dimension_semantics=("parallel", "parallel"),
            vmem_limit_bytes=vmem_limit,
        ),
        cost_estimate=cost,
    )(x2d)


def relu_forward(x):
    """Reproduces ReLU.forward from the reference module.

    - if x.ndim < 2: x is reshaped to (1, -1) and the OUTPUT keeps that
      (1, -1) shape (exactly what the numpy reference returns).
    - otherwise the output keeps the input shape.
    """
    x = jnp.asarray(x)
    if x.ndim < 2:
        x = x.reshape(1, -1)
    orig_shape = x.shape
    n = x.size
    if n == 0:
        return x

    cols = _choose_aligned_cols(n)
    if cols is not None:
        # Aligned path: lane-dense flat slab, unmasked vst on every block.
        x2d = x.reshape(n // cols, cols)
    else:
        # Ragged path: collapse leading dims, full trailing dim.  Masked
        # lane-tail stores in-kernel instead of pad+slice HBM round trips.
        x2d = x.reshape(n // orig_shape[-1], orig_shape[-1])

    return _relu_2d(x2d).reshape(orig_shape)


if __name__ == "__main__":
    key = jax.random.PRNGKey(0)

    # small NCHW-like activation tensor (aligned path: unmasked stores)
    x = jax.random.normal(key, (2, 4, 16, 16), dtype=jnp.float32)
    y = jax.block_until_ready(relu_forward(x))
    ref = jnp.maximum(0.0, x)
    assert y.shape == x.shape
    assert jnp.allclose(y, ref), "mismatch vs reference (4-D f32)"

    # ndim < 2 path (reshape to (1, -1)), tiny ragged size
    x1d = jax.random.normal(jax.random.PRNGKey(1), (37,), dtype=jnp.float32)
    y1d = jax.block_until_ready(relu_forward(x1d))
    assert y1d.shape == (1, 37)
    assert jnp.allclose(y1d, jnp.maximum(0.0, x1d).reshape(1, -1)), \
        "mismatch vs reference (1-D)"

    # ragged >=128 path (full-last-dim block, masked lane tail) in bf16
    xr = jax.random.normal(jax.random.PRNGKey(2), (5, 130), dtype=jnp.bfloat16)
    yr = jax.block_until_ready(relu_forward(xr))
    assert yr.shape == xr.shape
    assert jnp.array_equal(yr, jnp.maximum(jnp.bfloat16(0), xr)), \
        "mismatch vs reference (ragged bf16)"

    print("KERNEL_OK")
</pallas_src>

<mosaic_0001>
module attributes {stable_mosaic.version = 11 : i64} {
  func.func @_relu_kernel(%arg0: i32, %arg1: i32, %arg2: memref<1x2048xf32, #tpu.memory_space<vmem>>, %arg3: memref<1x2048xf32, #tpu.memory_space<vmem>>) attributes {dimension_semantics = [#tpu.dimension_semantics<parallel>, #tpu.dimension_semantics<parallel>], iteration_bounds = array<i64: 1, 1>, scalar_prefetch = 0 : i64, scratch_operands = 0 : i64, tpu.core_type = #tpu.core_type<tc>, window_params = [{transform_indices = @transform_0, window_bounds = array<i64: 1, 2048>}, {transform_indices = @transform_1, window_bounds = array<i64: 1, 2048>}]} {
    %c0 = arith.constant 0 : index
    %c0_0 = arith.constant 0 : index
    %0 = vector.load %arg2[%c0, %c0_0] : memref<1x2048xf32, #tpu.memory_space<vmem>>, vector<1x2048xf32>
    %cst = arith.constant 0.000000e+00 : f32
    %1 = vector.broadcast %cst : f32 to vector<1x2048xf32>
    %2 = arith.maximumf %0, %1 : vector<1x2048xf32>
    %c0_1 = arith.constant 0 : index
    %c0_2 = arith.constant 0 : index
    %3 = vector.load %arg3[%c0_1, %c0_2] : memref<1x2048xf32, #tpu.memory_space<vmem>>, vector<1x2048xf32>
    tpu.vector_store %arg3[%c0_1, %c0_2], %2 {strides = array<i32>} : memref<1x2048xf32, #tpu.memory_space<vmem>>, vector<1x2048xf32>,
    return
  }
  func.func @transform_0(%arg0: i32, %arg1: i32) -> (i32, i32) {
    %c0_i32 = arith.constant 0 : i32
    return %arg0, %arg1 : i32, i32
  }
  func.func @transform_1(%arg0: i32, %arg1: i32) -> (i32, i32) {
    %c0_i32 = arith.constant 0 : i32
    return %arg0, %arg1 : i32, i32
  }
}

</mosaic_0001>

<bundles_post_ra>
// kernel: tpu_custom_call.1
= control target key start
LH: loop header
LB: loop body
LE: loop exit
PB: predicated region body
PF: predicated region fallthrough
CT: control target
= control target key end

     0   :  { %6 = vsyncpa [#allocation3], 0  ;;  %s106_s0 = inlined_call_operand.hbm [shape: f32[1,2048], index: 0, kind: input, shape index: {}]   ;;  %s107_s1 = inlined_call_operand.hbm [shape: f32[1,2048], index: 1, kind: output, shape index: {}]  }
   0x1   :  { %7 = vsyncpa [#allocation4], 0  ;;  %s88_s6 = smov [#allocation2]  }
   0x2   :  { %s14_s7 = sshll.u32 %s88_s6, 4  ;;  %s15_s7 = int_to_ptr.vmem [resolvable:$true] %s14_s7 }
   0x3   :  { %s52_s8 = scalar_lea.vmem %s15_s7, 256  ;;  %p57_p1 = scmp.lt.s32.totalorder %s15_s7, %s15_s7 }
   0x4   :  { %p53_p0 = scmp.ne.s32.totalorder %s15_s7, %s52_s8  ;;  %p58_p2 = scmp.lt.s32.totalorder %s52_s8, %s52_s8 }
   0x6   :  { %p59_p3 = por %p58_p2, %p57_p1 }
   0x8   :  { %p60_p4 = pnand %p59_p3, %p53_p0 }
   0xa   :  { %63 = shalt.err (!%p60_p4)
}
   0xb   :  { %17 = dma.hbm_to_vmem [thread:$0]  %s106_s0, 256, %s15_s7, [#allocation3]  }
   0xc   :  { %84 = dma.done.wait [#allocation3], 256  }
   0xd   :  { %85 = vsyncadd [#allocation3], 4294967040  ;;  %s89_s11 = smov [#allocation5]   ;;  %v21_v0 = vld [vmem:[#allocation2] sm:$0xff]  ;;  %v22_v1 = vld [vmem:[#allocation2 + $0x8] sm:$0xff] }
   0xe   :  { %s33_s12 = sshll.u32 %s89_s11, 4  ;;  %v23_v2 = vmax.f32 %v21_v0, 0.0  ;;  %v24_v3 = vmax.f32 %v22_v1, 0.0  ;;  %s34_s12 = int_to_ptr.vmem [resolvable:$true] %s33_s12 }
   0xf   :  { %s64_s13 = scalar_lea.vmem %s34_s12, 256  ;;  %p69_p6 = scmp.lt.s32.totalorder %s34_s12, %s34_s12 }
  0x10   :  { %25 = vst [vmem:[#allocation5] sm:$0xff] %v23_v2  ;;  %26 = vst [vmem:[#allocation5 + $0x8] sm:$0xff] %v24_v3  ;;  %p65_p5 = scmp.ne.s32.totalorder %s34_s12, %s64_s13  ;;  %p70_p7 = scmp.lt.s32.totalorder %s64_s13, %s64_s13 }
  0x12   :  { %p71_p8 = por %p70_p7, %p69_p6 }
  0x14   :  { %p72_p9 = pnand %p71_p8, %p65_p5 }
  0x16   :  { %75 = shalt.err (!%p72_p9)
}
  0x17   :  { %36 = dma.vmem_to_hbm [thread:$0]  %s34_s12, 256, %s107_s1, [#allocation4]  }
  0x18   :  { %86 = dma.done.wait [#allocation4], 256  }
  0x19   :  { %87 = vsyncadd [#allocation4], 4294967040 }
  0x1a   :  { %40 = vsyncpa [#allocation3], 1 }
  0x1b   :  { %41 = vsyncpa [#allocation4], 1 }

</bundles_post_ra>
